<compile_context>
chip_gen: v5e
topology: v5e:2x2
jax: 0.10.0
libtpu: 0.0.40
codegen_flags: <defaults>
</compile_context>

<pallas_src>
import functools

import jax
import jax.numpy as jnp
from jax.experimental import pallas as pl
from jax.experimental.pallas import tpu as pltpu

C_IN, C_OUT, KH, KW = 3, 3, 3, 3   # Conv2d(3, 3, 3, stride=1, padding=1)


def _round_up(n, m):
    return ((n + m - 1) // m) * m


def _conv_kernel(x_ref, w_ref, b_ref, o_ref, *, bpb, wp, lout):
    """Fused 3x3 conv: one (C_OUT, 27) @ (27, LOUT) MXU dot per image.

    x_ref: (bpb, C_IN, L)      lane q of an image row = flattened padded pixel
                               r*Wp + c (zero tail-padded up to L, 128-mult).
    w_ref: (C_OUT, 27)         column index = (kh*KW + kw)*C_IN + ci.
    b_ref: (C_OUT, 1)
    o_ref: (bpb, C_OUT, LOUT)  lane p = r*Wp + c; only p < H*Wp with c < W are
                               valid output pixels, the rest is junk that the
                               wrapper strips.
    """
    w = w_ref[...]                                            # (C_OUT, 27)
    # Hoist the bias broadcast out of the per-image loop (JAX does not CSE
    # broadcast_in_dim, so doing it inside the unrolled loop re-emits it).
    bias = jnp.broadcast_to(b_ref[...], (C_OUT, lout))        # (C_OUT, LOUT)

    for b in range(bpb):                                      # bpb is 1 or B (tiny)
        xb = x_ref[b]                                         # (C_IN, L) single load
        # Stack the 9 lane-shifted tap views into the K = 27 contraction
        # operand (row t*C_IN + ci holds x_pad[ci, p + kh*Wp + kw]).
        taps = [xb[:, kh * wp + kw: kh * wp + kw + lout]
                for kh in range(KH) for kw in range(KW)]
        stacked = jnp.concatenate(taps, axis=0)               # (27, LOUT)
        # Single MXU contraction per image — no per-tap accumulate chain.
        out = jnp.dot(w, stacked, preferred_element_type=jnp.float32) + bias
        o_ref[b] = out.astype(o_ref.dtype)                    # lane-dense store


def prepare_conv_params(weight, bias):
    """One-time parameter prep (keep out of the hot path / cache it).

    weight: (C_OUT, C_IN, KH, KW) -> (C_OUT, KH*KW*C_IN), tap-major columns.
    bias:   (C_OUT,)              -> (C_OUT, 1)
    """
    w_flat = jnp.transpose(weight, (0, 2, 3, 1)).reshape(C_OUT, KH * KW * C_IN)
    b_col = bias.reshape(C_OUT, 1)
    return w_flat, b_col


def _on_v7x():
    """True if the default device looks like a TPU v7x (2 TensorCores/chip)."""
    try:
        kind = jax.devices()[0].device_kind.lower()
    except Exception:
        return False
    return "7" in kind


def conv2d_pallas(x_nchw, w_flat, b_col, *, split_batch=None):
    """x_nchw: (B, C_IN, H, W); w_flat/b_col from prepare_conv_params."""
    B, C, H, W = x_nchw.shape
    assert C == C_IN
    Hp, Wp = H + 2, W + 2                        # padding=1 on each side
    NW = H * Wp                                  # valid output lane count
    LOUT = _round_up(NW, 128)                    # lane-dense (unmasked) output width
    max_off = (KH - 1) * Wp + (KW - 1)           # largest tap lane offset
    L = _round_up(max(LOUT + max_off, Hp * Wp), 128)   # input lane width

    # Spatial zero-pad, flatten spatial into lanes, zero tail-pad to L.
    # (These fuse into one XLA op under jit.)
    xp = jnp.pad(x_nchw, ((0, 0), (0, 0), (1, 1), (1, 1)))          # (B, C, Hp, Wp)
    xflat = jnp.pad(xp.reshape(B, C_IN, Hp * Wp),
                    ((0, 0), (0, 0), (0, L - Hp * Wp)))             # (B, C_IN, L)

    if split_batch is None:
        split_batch = _on_v7x()
    if split_batch and B > 1:
        # v7x: one image per grid step, steps shard across the 2 TensorCores.
        grid, bpb, sem = (B,), 1, ("parallel",)
    else:
        # v5e/v6e: whole batch in one step (per-step overhead would dominate).
        grid, bpb, sem = (1,), B, ("arbitrary",)

    kernel = functools.partial(_conv_kernel, bpb=bpb, wp=Wp, lout=LOUT)
    flops = 2 * B * H * W * C_OUT * C_IN * KH * KW
    bytes_accessed = 4 * (xflat.size + w_flat.size + b_col.size + B * C_OUT * LOUT)

    # NOTE: blocks here are a few KiB; when scaling B/H/W, tile over B (and
    # rows of H) before resident double-buffered blocks approach ~16-24 MiB
    # (v7x has 64 MiB physical VMEM vs 128 MiB on v5e/v6e).
    out_slab = pl.pallas_call(
        kernel,
        out_shape=jax.ShapeDtypeStruct((B, C_OUT, LOUT), x_nchw.dtype),
        grid_spec=pltpu.PrefetchScalarGridSpec(
            num_scalar_prefetch=0,
            grid=grid,
            in_specs=[
                pl.BlockSpec((bpb, C_IN, L), lambda i: (i, 0, 0)),
                pl.BlockSpec((C_OUT, KH * KW * C_IN), lambda i: (0, 0)),
                pl.BlockSpec((C_OUT, 1), lambda i: (0, 0)),
            ],
            out_specs=pl.BlockSpec((bpb, C_OUT, LOUT), lambda i: (i, 0, 0)),
        ),
        compiler_params=pltpu.CompilerParams(dimension_semantics=sem),
        cost_estimate=pl.CostEstimate(
            flops=flops, transcendentals=0, bytes_accessed=bytes_accessed),
    )(xflat, w_flat, b_col)

    # (B, C_OUT, LOUT) -> keep valid lanes p < H*Wp -> (B, C_OUT, H, Wp)
    # -> strip the Wp->W pad columns -> NCHW.  (Fuses under jit.)
    return out_slab[:, :, :NW].reshape(B, C_OUT, H, Wp)[:, :, :, :W]


if __name__ == "__main__":
    key = jax.random.PRNGKey(0)
    kx, kw, kb = jax.random.split(key, 3)

    # Small deterministic inputs / parameters (Conv2d(3, 3, 3, 1, 1) shapes).
    B, H, W = 2, 16, 16
    x = jax.random.normal(kx, (B, C_IN, H, W), dtype=jnp.float32)
    fan_in = C_IN * KH * KW
    weight = jax.random.normal(kw, (C_OUT, C_IN, KH, KW), dtype=jnp.float32) / jnp.sqrt(fan_in)
    bias = jax.random.normal(kb, (C_OUT,), dtype=jnp.float32) * 0.1

    # One-time parameter prep, outside the hot path.
    w_flat, b_col = prepare_conv_params(weight, bias)

    fwd = jax.jit(conv2d_pallas, static_argnames=("split_batch",))
    out = jax.block_until_ready(fwd(x, w_flat, b_col))

    # Sanity check against XLA's conv (same semantics as torch.nn.Conv2d).
    ref = jax.lax.conv_general_dilated(
        x, weight, window_strides=(1, 1), padding=((1, 1), (1, 1)),
        dimension_numbers=("NCHW", "OIHW", "NCHW"),
    ) + bias.reshape(1, C_OUT, 1, 1)
    assert out.shape == (B, C_OUT, H, W)
    assert jnp.allclose(out, ref, atol=1e-4, rtol=1e-4)

    print("KERNEL_OK")
</pallas_src>

<mosaic_0001>
module attributes {stable_mosaic.version = 11 : i64} {
  func.func @_conv_kernel(%arg0: i32, %arg1: memref<2x3x512xf32, #tpu.memory_space<vmem>>, %arg2: memref<3x27xf32, #tpu.memory_space<vmem>>, %arg3: memref<3x1xf32, #tpu.memory_space<vmem>>, %arg4: memref<2x3x384xf32, #tpu.memory_space<vmem>>) attributes {dimension_semantics = [#tpu.dimension_semantics<arbitrary>], iteration_bounds = array<i64: 1>, scalar_prefetch = 0 : i64, scratch_operands = 0 : i64, tpu.core_type = #tpu.core_type<tc>, window_params = [{transform_indices = @transform_0, window_bounds = array<i64: 2, 3, 512>}, {pipeline_mode = #tpu.pipeline_mode<synchronous>, transform_indices = @transform_1, window_bounds = array<i64: 3, 27>}, {pipeline_mode = #tpu.pipeline_mode<synchronous>, transform_indices = @transform_2, window_bounds = array<i64: 3, 1>}, {transform_indices = @transform_3, window_bounds = array<i64: 2, 3, 384>}]} {
    %c0 = arith.constant 0 : index
    %c0_0 = arith.constant 0 : index
    %0 = vector.load %arg2[%c0, %c0_0] : memref<3x27xf32, #tpu.memory_space<vmem>>, vector<3x27xf32>
    %c0_1 = arith.constant 0 : index
    %c0_2 = arith.constant 0 : index
    %1 = vector.load %arg3[%c0_1, %c0_2] : memref<3x1xf32, #tpu.memory_space<vmem>>, vector<3x1xf32>
    %2 = vector.shape_cast %1 : vector<3x1xf32> to vector<3x1xf32>
    %3 = vector.broadcast %2 : vector<3x1xf32> to vector<3x384xf32>
    %c0_3 = arith.constant 0 : index
    %c0_4 = arith.constant 0 : index
    %c0_5 = arith.constant 0 : index
    %4 = vector.load %arg1[%c0_3, %c0_4, %c0_5] : memref<2x3x512xf32, #tpu.memory_space<vmem>>, vector<1x3x512xf32>
    %5 = vector.shape_cast %4 : vector<1x3x512xf32> to vector<3x512xf32>
    %6 = vector.extract_strided_slice %5 {offsets = [0, 0], sizes = [3, 384], strides = [1, 1]} : vector<3x512xf32> to vector<3x384xf32>
    %7 = vector.extract_strided_slice %5 {offsets = [0, 1], sizes = [3, 384], strides = [1, 1]} : vector<3x512xf32> to vector<3x384xf32>
    %8 = vector.extract_strided_slice %5 {offsets = [0, 2], sizes = [3, 384], strides = [1, 1]} : vector<3x512xf32> to vector<3x384xf32>
    %9 = vector.extract_strided_slice %5 {offsets = [0, 18], sizes = [3, 384], strides = [1, 1]} : vector<3x512xf32> to vector<3x384xf32>
    %10 = vector.extract_strided_slice %5 {offsets = [0, 19], sizes = [3, 384], strides = [1, 1]} : vector<3x512xf32> to vector<3x384xf32>
    %11 = vector.extract_strided_slice %5 {offsets = [0, 20], sizes = [3, 384], strides = [1, 1]} : vector<3x512xf32> to vector<3x384xf32>
    %12 = vector.extract_strided_slice %5 {offsets = [0, 36], sizes = [3, 384], strides = [1, 1]} : vector<3x512xf32> to vector<3x384xf32>
    %13 = vector.extract_strided_slice %5 {offsets = [0, 37], sizes = [3, 384], strides = [1, 1]} : vector<3x512xf32> to vector<3x384xf32>
    %14 = vector.extract_strided_slice %5 {offsets = [0, 38], sizes = [3, 384], strides = [1, 1]} : vector<3x512xf32> to vector<3x384xf32>
    %15 = tpu.concatenate %6, %7, %8, %9, %10, %11, %12, %13, %14 in 0 : vector<3x384xf32>, vector<3x384xf32>, vector<3x384xf32>, vector<3x384xf32>, vector<3x384xf32>, vector<3x384xf32>, vector<3x384xf32>, vector<3x384xf32>, vector<3x384xf32> -> vector<27x384xf32>
    %cst = arith.constant dense<0.000000e+00> : vector<3x384xf32>
    %16 = tpu.matmul %0, %15, %cst {dimension_numbers = #tpu.dot_dimension_numbers<[1], [0], [0], [1], [0, 0, 1, 1], [], []>} : vector<3x27xf32>, vector<27x384xf32>, vector<3x384xf32> -> vector<3x384xf32>
    %17 = arith.addf %16, %3 : vector<3x384xf32>
    %c0_6 = arith.constant 0 : index
    %c0_7 = arith.constant 0 : index
    %c0_8 = arith.constant 0 : index
    %18 = vector.load %arg4[%c0_6, %c0_7, %c0_8] : memref<2x3x384xf32, #tpu.memory_space<vmem>>, vector<1x3x384xf32>
    %19 = vector.shape_cast %18 : vector<1x3x384xf32> to vector<3x384xf32>
    %20 = vector.shape_cast %17 : vector<3x384xf32> to vector<1x3x384xf32>
    tpu.vector_store %arg4[%c0_6, %c0_7, %c0_8], %20 {strides = array<i32>} : memref<2x3x384xf32, #tpu.memory_space<vmem>>, vector<1x3x384xf32>,
    %c1 = arith.constant 1 : index
    %c0_9 = arith.constant 0 : index
    %c0_10 = arith.constant 0 : index
    %21 = vector.load %arg1[%c1, %c0_9, %c0_10] : memref<2x3x512xf32, #tpu.memory_space<vmem>>, vector<1x3x512xf32>
    %22 = vector.shape_cast %21 : vector<1x3x512xf32> to vector<3x512xf32>
    %23 = vector.extract_strided_slice %22 {offsets = [0, 0], sizes = [3, 384], strides = [1, 1]} : vector<3x512xf32> to vector<3x384xf32>
    %24 = vector.extract_strided_slice %22 {offsets = [0, 1], sizes = [3, 384], strides = [1, 1]} : vector<3x512xf32> to vector<3x384xf32>
    %25 = vector.extract_strided_slice %22 {offsets = [0, 2], sizes = [3, 384], strides = [1, 1]} : vector<3x512xf32> to vector<3x384xf32>
    %26 = vector.extract_strided_slice %22 {offsets = [0, 18], sizes = [3, 384], strides = [1, 1]} : vector<3x512xf32> to vector<3x384xf32>
    %27 = vector.extract_strided_slice %22 {offsets = [0, 19], sizes = [3, 384], strides = [1, 1]} : vector<3x512xf32> to vector<3x384xf32>
    %28 = vector.extract_strided_slice %22 {offsets = [0, 20], sizes = [3, 384], strides = [1, 1]} : vector<3x512xf32> to vector<3x384xf32>
    %29 = vector.extract_strided_slice %22 {offsets = [0, 36], sizes = [3, 384], strides = [1, 1]} : vector<3x512xf32> to vector<3x384xf32>
    %30 = vector.extract_strided_slice %22 {offsets = [0, 37], sizes = [3, 384], strides = [1, 1]} : vector<3x512xf32> to vector<3x384xf32>
    %31 = vector.extract_strided_slice %22 {offsets = [0, 38], sizes = [3, 384], strides = [1, 1]} : vector<3x512xf32> to vector<3x384xf32>
    %32 = tpu.concatenate %23, %24, %25, %26, %27, %28, %29, %30, %31 in 0 : vector<3x384xf32>, vector<3x384xf32>, vector<3x384xf32>, vector<3x384xf32>, vector<3x384xf32>, vector<3x384xf32>, vector<3x384xf32>, vector<3x384xf32>, vector<3x384xf32> -> vector<27x384xf32>
    %cst_11 = arith.constant dense<0.000000e+00> : vector<3x384xf32>
    %33 = tpu.matmul %0, %32, %cst_11 {dimension_numbers = #tpu.dot_dimension_numbers<[1], [0], [0], [1], [0, 0, 1, 1], [], []>} : vector<3x27xf32>, vector<27x384xf32>, vector<3x384xf32> -> vector<3x384xf32>
    %34 = arith.addf %33, %3 : vector<3x384xf32>
    %c1_12 = arith.constant 1 : index
    %c0_13 = arith.constant 0 : index
    %c0_14 = arith.constant 0 : index
    %35 = vector.load %arg4[%c1_12, %c0_13, %c0_14] : memref<2x3x384xf32, #tpu.memory_space<vmem>>, vector<1x3x384xf32>
    %36 = vector.shape_cast %35 : vector<1x3x384xf32> to vector<3x384xf32>
    %37 = vector.shape_cast %34 : vector<3x384xf32> to vector<1x3x384xf32>
    tpu.vector_store %arg4[%c1_12, %c0_13, %c0_14], %37 {strides = array<i32>} : memref<2x3x384xf32, #tpu.memory_space<vmem>>, vector<1x3x384xf32>,
    return
  }
  func.func @transform_0(%arg0: i32) -> (i32, i32, i32) {
    %c0_i32 = arith.constant 0 : i32
    %c0_i32_0 = arith.constant 0 : i32
    %c0_i32_1 = arith.constant 0 : i32
    return %arg0, %c0_i32, %c0_i32_0 : i32, i32, i32
  }
  func.func @transform_1(%arg0: i32) -> (i32, i32) {
    %c0_i32 = arith.constant 0 : i32
    %c0_i32_0 = arith.constant 0 : i32
    %c0_i32_1 = arith.constant 0 : i32
    return %c0_i32, %c0_i32_0 : i32, i32
  }
  func.func @transform_2(%arg0: i32) -> (i32, i32) {
    %c0_i32 = arith.constant 0 : i32
    %c0_i32_0 = arith.constant 0 : i32
    %c0_i32_1 = arith.constant 0 : i32
    return %c0_i32, %c0_i32_0 : i32, i32
  }
  func.func @transform_3(%arg0: i32) -> (i32, i32, i32) {
    %c0_i32 = arith.constant 0 : i32
    %c0_i32_0 = arith.constant 0 : i32
    %c0_i32_1 = arith.constant 0 : i32
    return %arg0, %c0_i32, %c0_i32_0 : i32, i32, i32
  }
}

</mosaic_0001>

<bundles_post_ra>
// kernel: conv2d_pallas.1
= control target key start
LH: loop header
LB: loop body
LE: loop exit
PB: predicated region body
PF: predicated region fallthrough
CT: control target
= control target key end

     0   :  { %v801_v0 = vmov 0   ;;  %s803_s18 = smov 126   ;;  %s804_s19 = smov 110   ;;  %vm105_vm0 = vcmask 900096   ;;  %vm79_vm1 = vcmask 1031168   ;;  %vm128_vm2 = vcmask 891904   ;;  %s1265_s2 = inlined_call_operand.vmem [shape: f32[3,1], index: 2, kind: input, shape index: {}]   ;;  %s1266_s0 = inlined_call_operand.vmem [shape: f32[2,3,512], index: 0, kind: input, shape index: {}]   ;;  %s1267_s1 = inlined_call_operand.vmem [shape: f32[3,27], index: 1, kind: input, shape index: {}]   ;;  %s1268_s3 = inlined_call_operand.vmem [shape: f32[2,3,384], index: 3, kind: output, shape index: {}]  }
   0x1   :  { %665 = vset.pattern.permute.xlu0 %v801_v0  ;;  %v15_v1 = vld [vmem:[%s1265_s2] sm:$0x7]  ;;  %v842_v3 = vld [vmem:[%s1266_s0 + $0x8] sm:$0x77]  ;;  %s802_s2 = smov 127   ;;  %s805_s20 = smov 109  }
   0x2   :  { %v836_v2 = vld [vmem:[%s1266_s0] sm:$0x77]  ;;  %18 = vperm.xlu0 %665, %v15_v1   ;;  %27 = vst [vmem:[#allocation1 + $0x10] ss:$2 sm:$0xff] %v842_v3  ;;  %s806_s21 = smov 108   ;;  %s807_s22 = smov 92  }
   0x3   :  { %25 = vst [vmem:[#allocation1] ss:$2 sm:$0xff] %v836_v2  ;;  %s808_s23 = smov 91   ;;  %v905_v54 = vld [vmem:[%s1266_s0 + $0x10] sm:$0x77]  ;;  %s809_s28 = smov 90  }
   0x4   :  { %v910_v55 = vld [vmem:[%s1266_s0 + $0x18] sm:$0x77]  ;;  %vm240_vm3 = vcmask 1040384   ;;  %vm228_vm4 = vcmask 736256   ;;  %vm53_vm5 = vcmask 1039360   ;;  %vm232_vm6 = vcmask 1042432  }
   0x5   :  { %vm154_vm7 = vcmask 883712   ;;  %vm206_vm8 = vcmask 744448   ;;  %vm244_vm9 = vcmask 1043456   ;;  %vm180_vm10 = vcmask 752640  }
   0x6   :  { %vm252_vm11 = vcmask 1041408   ;;  %vm256_vm12 = vcmask 1044480   ;;  %vm248_vm13 = vcmask 1046528   ;;  %vm236_vm14 = vcmask 1045504  }
   0x7   :  { %vm260_vm15 = vcmask 220160  }
   0x9   :  { %v850_v6 = vld.sshfl [vmem:[#allocation1 + $0x10] sm:$0xff pattern:$0x75316420] }
   0xa   :  { %v845_v4 = vld.sshfl [vmem:[#allocation1] sm:$0xff pattern:$0x75316420]  ;;  %v847_v5 = vld.sshfl [vmem:[#allocation1 + $0x8] sm:$0xff pattern:$0x75316420] }
   0xb   :  { %34 = vst [vmem:[#allocation1] ss:$2 sm:$0xff] %v836_v2 }
   0xc   :  { %36 = vst [vmem:[#allocation1 + $0x10] ss:$2 sm:$0xff] %v842_v3 }
  0x12   :  { %v37_v7 = vld.sshfl [vmem:[#allocation1] sm:$0xff pattern:$0x75316420]  ;;  %v38_v8 = vld.sshfl [vmem:[#allocation1 + $0x8] sm:$0xff pattern:$0x75316420] }
  0x13   :  { %60 = vst [vmem:[#allocation1] ss:$2 sm:$0xff] %v836_v2  ;;  %v41_v9 = vrot.slane %v37_v7, 5  ;;  %v42_v10 = vrot.slane %v38_v8, 5 }
  0x14   :  { %v854_v11 = vld.sshfl [vmem:[#allocation1 + $0x10] sm:$0xff pattern:$0x75316420]  ;;  %v856_v12 = vld.sshfl [vmem:[#allocation1 + $0x18] sm:$0xff pattern:$0x75316420] }
  0x15   :  { %v666_v13 = vpack.i.bf16 %v42_v10, %v41_v9  ;;  %62 = vst [vmem:[#allocation1 + $0x10] ss:$2 sm:$0xff] %v842_v3  ;;  %v43_v63 = vrot.slane %v854_v11, 5  ;;  %v44_v0 = vrot.slane %v856_v12, 5 }
  0x17   :  { %667 = vrot.lane.b32.xlu0 %v666_v13, %s802_s2 }
  0x1a   :  { %v63_v14 = vld.sshfl [vmem:[#allocation1] sm:$0xff pattern:$0x75316420]  ;;  %v64_v15 = vld.sshfl [vmem:[#allocation1 + $0x8] sm:$0xff pattern:$0x75316420] }
  0x1b   :  { %86 = vst [vmem:[#allocation1] ss:$2 sm:$0xff] %v836_v2  ;;  %v67_v16 = vrot.slane %v63_v14, 2  ;;  %v68_v17 = vrot.slane %v64_v15, 2 }
  0x1c   :  { %v861_v18 = vld.sshfl [vmem:[#allocation1 + $0x10] sm:$0xff pattern:$0x75316420]  ;;  %v863_v19 = vld.sshfl [vmem:[#allocation1 + $0x18] sm:$0xff pattern:$0x75316420] }
  0x1d   :  { %v671_v20 = vpack.i.bf16 %v68_v17, %v67_v16  ;;  %88 = vst [vmem:[#allocation1 + $0x10] ss:$2 sm:$0xff] %v842_v3  ;;  %v69_v11 = vrot.slane %v861_v18, 2 }
  0x1f   :  { %672 = vrot.lane.b32.xlu0 %v671_v20, %s803_s18 }
  0x22   :  { %v89_v21 = vld.sshfl [vmem:[#allocation1] sm:$0xff pattern:$0x75316420]  ;;  %v90_v22 = vld.sshfl [vmem:[#allocation1 + $0x8] sm:$0xff pattern:$0x75316420] }
  0x23   :  { %v93_v23 = vrot.slane %v89_v21, 7  ;;  %v94_v24 = vrot.slane %v90_v22, 7  ;;  %113 = vst [vmem:[#allocation1 + $0x1] ss:$2 sm:$0xff] %v836_v2  ;;  %v70_v21 = vrot.slane %v863_v19, 2 }
  0x24   :  { %v868_v25 = vld.sshfl [vmem:[#allocation1 + $0x10] sm:$0xff pattern:$0x75316420]  ;;  %v870_v26 = vld.sshfl [vmem:[#allocation1 + $0x18] sm:$0xff pattern:$0x75316420] }
  0x25   :  { %v676_v27 = vpack.i.bf16 %v94_v24, %v93_v23  ;;  %115 = vst [vmem:[#allocation1 + $0x11] ss:$2 sm:$0xff] %v842_v3  ;;  %v95_v23 = vrot.slane %v868_v25, 7  ;;  %v96_v19 = vrot.slane %v870_v26, 7 }
  0x27   :  { %677 = vrot.lane.b32.xlu1 %v676_v27, %s804_s19 }
  0x2a   :  { %v116_v28 = vld.sshfl [vmem:[#allocation1] sm:$0xff pattern:$0x75316420]  ;;  %v117_v29 = vld.sshfl [vmem:[#allocation1 + $0x8] sm:$0xff pattern:$0x75316420] }
  0x2b   :  { %135 = vst [vmem:[#allocation1] ss:$2 sm:$0xff] %v836_v2  ;;  %v681_v30 = vpack.i.bf16 %v117_v29, %v116_v28 }
  0x2c   :  { %v875_v31 = vld.sshfl [vmem:[#allocation1 + $0x10] sm:$0xff pattern:$0x75316420]  ;;  %v877_v32 = vld.sshfl [vmem:[#allocation1 + $0x18] sm:$0xff pattern:$0x75316420] }
  0x2d   :  { %682 = vrot.lane.b32.xlu0 %v681_v30, %s805_s20  ;;  %137 = vst [vmem:[#allocation1 + $0x10] ss:$2 sm:$0xff] %v842_v3 }
  0x32   :  { %v138_v33 = vld.sshfl [vmem:[#allocation1] sm:$0xff pattern:$0x75316420]  ;;  %v139_v34 = vld.sshfl [vmem:[#allocation1 + $0x8] sm:$0xff pattern:$0x75316420] }
  0x33   :  { %v142_v35 = vrot.slane %v138_v33, 1  ;;  %v143_v36 = vrot.slane %v139_v34, 1  ;;  %161 = vst [vmem:[#allocation1] ss:$2 sm:$0xff] %v836_v2 }
  0x34   :  { %v882_v37 = vld.sshfl [vmem:[#allocation1 + $0x10] sm:$0xff pattern:$0x75316420]  ;;  %v884_v38 = vld.sshfl [vmem:[#allocation1 + $0x18] sm:$0xff pattern:$0x75316420] }
  0x35   :  { %v686_v39 = vpack.i.bf16 %v143_v36, %v142_v35  ;;  %163 = vst [vmem:[#allocation1 + $0x10] ss:$2 sm:$0xff] %v842_v3 }
  0x37   :  { %687 = vrot.lane.b32.xlu1 %v686_v39, %s806_s21 }
  0x3a   :  { %v164_v40 = vld.sshfl [vmem:[#allocation1] sm:$0xff pattern:$0x75316420]  ;;  %v165_v41 = vld.sshfl [vmem:[#allocation1 + $0x8] sm:$0xff pattern:$0x75316420] }
  0x3b   :  { %v168_v42 = vrot.slane %v164_v40, 6  ;;  %v169_v43 = vrot.slane %v165_v41, 6  ;;  %187 = vst [vmem:[#allocation1] ss:$2 sm:$0xff] %v836_v2 }
  0x3c   :  { %v889_v44 = vld.sshfl [vmem:[#allocation1 + $0x10] sm:$0xff pattern:$0x75316420]  ;;  %v891_v45 = vld.sshfl [vmem:[#allocation1 + $0x18] sm:$0xff pattern:$0x75316420] }
  0x3d   :  { %v691_v46 = vpack.i.bf16 %v169_v43, %v168_v42  ;;  %189 = vst [vmem:[#allocation1 + $0x10] ss:$2 sm:$0xff] %v842_v3 }
  0x3f   :  { %692 = vrot.lane.b32.xlu1 %v691_v46, %s807_s22 }
  0x42   :  { %v190_v47 = vld.sshfl [vmem:[#allocation1] sm:$0xff pattern:$0x75316420]  ;;  %v191_v48 = vld.sshfl [vmem:[#allocation1 + $0x8] sm:$0xff pattern:$0x75316420] }
  0x43   :  { %v194_v49 = vrot.slane %v190_v47, 3  ;;  %v195_v50 = vrot.slane %v191_v48, 3  ;;  %213 = vst [vmem:[#allocation1] ss:$2 sm:$0xff] %v836_v2 }
  0x44   :  { %v896_v51 = vld.sshfl [vmem:[#allocation1 + $0x10] sm:$0xff pattern:$0x75316420]  ;;  %v898_v52 = vld.sshfl [vmem:[#allocation1 + $0x18] sm:$0xff pattern:$0x75316420] }
  0x45   :  { %v696_v53 = vpack.i.bf16 %v195_v50, %v194_v49  ;;  %215 = vst [vmem:[#allocation1 + $0x10] ss:$2 sm:$0xff] %v842_v3 }
  0x47   :  { %697 = vrot.lane.b32.xlu2 %v696_v53, %s808_s23 }
  0x4a   :  { %v216_v56 = vld.sshfl [vmem:[#allocation1] sm:$0xff pattern:$0x75316420]  ;;  %v217_v57 = vld.sshfl [vmem:[#allocation1 + $0x8] sm:$0xff pattern:$0x75316420] }
  0x4b   :  { %342 = vst [vmem:[#allocation1] ss:$2 sm:$0xff] %v905_v54 }
  0x4c   :  { %v218_v58 = vld.sshfl [vmem:[#allocation1 + $0x10] sm:$0xff pattern:$0x75316420]  ;;  %v219_v59 = vld.sshfl [vmem:[#allocation1 + $0x18] sm:$0xff pattern:$0x75316420] }
  0x4d   :  { %224 = vrot.lane.b32.xlu0 %v218_v58, %s809_s28  ;;  %344 = vst [vmem:[#allocation1 + $0x10] ss:$2 sm:$0xff] %v910_v55 }
  0x4f   :  { %220 = vrot.lane.b32.xlu2 %v216_v56, %s809_s28 }
  0x52   :  { %v916_v60 = vld.sshfl [vmem:[#allocation1] sm:$0xff pattern:$0x75316420]  ;;  %v918_v61 = vld.sshfl [vmem:[#allocation1 + $0x8] sm:$0xff pattern:$0x75316420] }
  0x53   :  { %351 = vst [vmem:[#allocation1] ss:$2 sm:$0xff] %v905_v54 }
  0x54   :  { %v921_v62 = vld.sshfl [vmem:[#allocation1 + $0x10] sm:$0xff pattern:$0x75316420] }
  0x55   :  { %353 = vst [vmem:[#allocation1 + $0x10] ss:$2 sm:$0xff] %v910_v55  ;;  %226 = vrot.lane.b32.xlu0 %v219_v59, %s809_s28 }
  0x57   :  { %222 = vrot.lane.b32.xlu2 %v217_v57, %s809_s28  ;;  %v144_v57 = vrot.slane %v882_v37, 1  ;;  %v145_v37 = vrot.slane %v884_v38, 1 }
  0x5a   :  { %v354_v1 = vld.sshfl [vmem:[#allocation1] sm:$0xff pattern:$0x75316420]  ;;  %v355_v2 = vld.sshfl [vmem:[#allocation1 + $0x8] sm:$0xff pattern:$0x75316420] }
  0x5b   :  { %v358_v3 = vrot.slane %v354_v1, 5  ;;  %376 = vst [vmem:[#allocation1] ss:$2 sm:$0xff] %v905_v54  ;;  %v359_v7 = vrot.slane %v355_v2, 5 }
  0x5c   :  { %v929_v8 = vld.sshfl [vmem:[#allocation1 + $0x10] sm:$0xff pattern:$0x75316420]  ;;  %v931_v9 = vld.sshfl [vmem:[#allocation1 + $0x18] sm:$0xff pattern:$0x75316420] }
  0x5d   :  { %v701_v10 = vpack.i.bf16 %v358_v3, %v43_v63  ;;  %378 = vst [vmem:[#allocation1 + $0x10] ss:$2 sm:$0xff] %v910_v55  ;;  %v706_v13 = vpack.i.bf16 %v44_v0, %v359_v7  ;;  %v170_v3 = vrot.slane %v889_v44, 6 }
  0x5f   :  { %702 = vrot.lane.b32.xlu2 %v701_v10, %s802_s2  ;;  %707 = vrot.lane.b32.xlu0 %v706_v13, %s802_s2  ;;  %v196_v13 = vrot.slane %v896_v51, 3  ;;  %v171_v51 = vrot.slane %v891_v45, 6 }
  0x62   :  { %v379_v12 = vld.sshfl [vmem:[#allocation1] sm:$0xff pattern:$0x75316420]  ;;  %v380_v14 = vld.sshfl [vmem:[#allocation1 + $0x8] sm:$0xff pattern:$0x75316420] }
  0x63   :  { %v383_v15 = vrot.slane %v379_v12, 2  ;;  %401 = vst [vmem:[#allocation1] ss:$2 sm:$0xff] %v905_v54  ;;  %v384_v22 = vrot.slane %v380_v14, 2 }
  0x64   :  { %v381_v16 = vld.sshfl [vmem:[#allocation1 + $0x10] sm:$0xff pattern:$0x75316420]  ;;  %v382_v17 = vld.sshfl [vmem:[#allocation1 + $0x18] sm:$0xff pattern:$0x75316420] }
  0x65   :  { %v711_v20 = vpack.i.bf16 %v383_v15, %v69_v11  ;;  %403 = vst [vmem:[#allocation1 + $0x10] ss:$2 sm:$0xff] %v910_v55  ;;  %v716_v28 = vpack.i.bf16 %v70_v21, %v384_v22  ;;  %v385_v35 = vrot.slane %v381_v16, 2  ;;  %v386_v25 = vrot.slane %v382_v17, 2 }
  0x67   :  { %712 = vrot.lane.b32.xlu1 %v711_v20, %s803_s18  ;;  %v721_v41 = vpack.i.bf16 %v386_v25, %v385_v35 }
  0x6a   :  { %v404_v24 = vld.sshfl [vmem:[#allocation1] sm:$0xff pattern:$0x75316420]  ;;  %v405_v27 = vld.sshfl [vmem:[#allocation1 + $0x8] sm:$0xff pattern:$0x75316420] }
  0x6b   :  { %v408_v18 = vrot.slane %v404_v24, 7  ;;  %427 = vst [vmem:[#allocation1 + $0x1] ss:$2 sm:$0xff] %v905_v54  ;;  %v409_v34 = vrot.slane %v405_v27, 7 }
  0x6c   :  { %v406_v29 = vld.sshfl [vmem:[#allocation1 + $0x10] sm:$0xff pattern:$0x75316420]  ;;  %v407_v30 = vld.sshfl [vmem:[#allocation1 + $0x18] sm:$0xff pattern:$0x75316420] }
  0x6d   :  { %v726_v33 = vpack.i.bf16 %v408_v18, %v95_v23  ;;  %429 = vst [vmem:[#allocation1 + $0x11] ss:$2 sm:$0xff] %v910_v55  ;;  %v731_v40 = vpack.i.bf16 %v96_v19, %v409_v34  ;;  %v410_v26 = vrot.slane %v406_v29, 7  ;;  %v411_v46 = vrot.slane %v407_v30, 7 }
  0x6e   :  { %v197_v23 = vrot.slane %v898_v52, 3 }
  0x6f   :  { %727 = vrot.lane.b32.xlu2 %v726_v33, %s804_s19  ;;  %717 = vrot.lane.b32.xlu1 %v716_v28, %s803_s18  ;;  %v736_v49 = vpack.i.bf16 %v411_v46, %v410_v26 }
  0x72   :  { %v431_v36 = vld.sshfl [vmem:[#allocation1 + $0x8] sm:$0xff pattern:$0x75316420]  ;;  %v430_v39 = vld.sshfl [vmem:[#allocation1] sm:$0xff pattern:$0x75316420] }
  0x73   :  { %448 = vst [vmem:[#allocation1] ss:$2 sm:$0xff] %v905_v54  ;;  %v746_v50 = vpack.i.bf16 %v877_v32, %v431_v36  ;;  %v741_v0 = vpack.i.bf16 %v430_v39, %v875_v31 }
  0x74   :  { %v948_v42 = vld.sshfl [vmem:[#allocation1 + $0x10] sm:$0xff pattern:$0x75316420]  ;;  %v950_v43 = vld.sshfl [vmem:[#allocation1 + $0x18] sm:$0xff pattern:$0x75316420]  ;;  %v969_v12 = vpop.permute.xlu0 %18 }
  0x75   :  { %450 = vst [vmem:[#allocation1 + $0x10] ss:$2 sm:$0xff] %v910_v55  ;;  %v796_v36 = vpack.i.bf16 %v950_v43, %v948_v42  ;;  %v361_v43 = vrot.slane %v931_v9, 5 }
  0x77   :  { %732 = vrot.lane.b32.xlu2 %v731_v40, %s804_s19  ;;  %722 = vrot.lane.b32.xlu1 %v721_v41, %s803_s18 }
  0x7a   :  { %v451_v47 = vld.sshfl [vmem:[#allocation1] sm:$0xff pattern:$0x75316420]  ;;  %v452_v48 = vld.sshfl [vmem:[#allocation1 + $0x8] sm:$0xff pattern:$0x75316420] }
  0x7b   :  { %473 = vst [vmem:[#allocation1] ss:$2 sm:$0xff] %v905_v54  ;;  %v455_v58 = vrot.slane %v451_v47, 1  ;;  %v456_v10 = vrot.slane %v452_v48, 1 }
  0x7c   :  { %v453_v53 = vld.sshfl [vmem:[#allocation1 + $0x10] sm:$0xff pattern:$0x75316420]  ;;  %v454_v56 = vld.sshfl [vmem:[#allocation1 + $0x18] sm:$0xff pattern:$0x75316420] }
  0x7d   :  { %475 = vst [vmem:[#allocation1 + $0x10] ss:$2 sm:$0xff] %v910_v55  ;;  %v751_v1 = vpack.i.bf16 %v455_v58, %v144_v57  ;;  %v756_v15 = vpack.i.bf16 %v145_v37, %v456_v10  ;;  %v457_v38 = vrot.slane %v453_v53, 1  ;;  %v458_v44 = vrot.slane %v454_v56, 1 }
  0x7f   :  { %737 = vrot.lane.b32.xlu2 %v736_v49, %s804_s19  ;;  %747 = vrot.lane.b32.xlu1 %v746_v50, %s805_s20 }
  0x82   :  { %v476_v59 = vld.sshfl [vmem:[#allocation1] sm:$0xff pattern:$0x75316420]  ;;  %v477_v63 = vld.sshfl [vmem:[#allocation1 + $0x8] sm:$0xff pattern:$0x75316420] }
  0x83   :  { %498 = vst [vmem:[#allocation1] ss:$2 sm:$0xff] %v905_v54  ;;  %v480_v7 = vrot.slane %v476_v59, 6  ;;  %v481_v22 = vrot.slane %v477_v63, 6 }
  0x84   :  { %v478_v32 = vld.sshfl [vmem:[#allocation1 + $0x10] sm:$0xff pattern:$0x75316420]  ;;  %v479_v2 = vld.sshfl [vmem:[#allocation1 + $0x18] sm:$0xff pattern:$0x75316420] }
  0x85   :  { %500 = vst [vmem:[#allocation1 + $0x10] ss:$2 sm:$0xff] %v910_v55  ;;  %v766_v14 = vpack.i.bf16 %v480_v7, %v170_v3  ;;  %v771_v27 = vpack.i.bf16 %v171_v51, %v481_v22  ;;  %v483_v29 = vrot.slane %v479_v2, 6 }
  0x87   :  { %742 = vrot.lane.b32.xlu2 %v741_v0, %s805_s20  ;;  %752 = vrot.lane.b32.xlu1 %v751_v1, %s806_s21 }
  0x89   :  { %v978_v28 = vpop.permute.xlu0 %667 }
  0x8a   :  { %v501_v31 = vld.sshfl [vmem:[#allocation1] sm:$0xff pattern:$0x75316420]  ;;  %v502_v11 = vld.sshfl [vmem:[#allocation1 + $0x8] sm:$0xff pattern:$0x75316420]  ;;  %v670_v50 = vunpack.i.h.bf16 %v978_v28  ;;  %v669_v53 = vunpack.i.l.bf16 %v978_v28 }
  0x8b   :  { %v505_v16 = vrot.slane %v501_v31, 3  ;;  %523 = vst [vmem:[#allocation1] ss:$2 sm:$0xff] %v905_v54  ;;  %v506_v24 = vrot.slane %v502_v11, 3  ;;  %v761_v54 = vpack.i.bf16 %v458_v44, %v457_v38 }
  0x8c   :  { %v503_v17 = vld.sshfl [vmem:[#allocation1 + $0x10] sm:$0xff pattern:$0x75316420]  ;;  %v504_v20 = vld.sshfl [vmem:[#allocation1 + $0x18] sm:$0xff pattern:$0x75316420]  ;;  %v54_v10 = vsel %vm53_vm5, %v669_v53, %v670_v50 }
  0x8d   :  { %v781_v21 = vpack.i.bf16 %v505_v16, %v196_v13  ;;  %525 = vst [vmem:[#allocation1 + $0x10] ss:$2 sm:$0xff] %v910_v55  ;;  %v786_v18 = vpack.i.bf16 %v197_v23, %v506_v24  ;;  %v482_v55 = vrot.slane %v478_v32, 6  ;;  %v507_v45 = vrot.slane %v503_v17, 3 }
  0x8e   :  { %v508_v30 = vrot.slane %v504_v20, 3  ;;  %v360_v20 = vrot.slane %v929_v8, 5  ;;  %v233_v38 = vsel %vm232_vm6, %v845_v4, %v54_v10  ;;  %v1054_v8 = vld [vmem:[%s1267_s1] sm:$0x7] }
  0x8f   :  { %767 = vrot.lane.b32.xlu2 %v766_v14, %s807_s22  ;;  %757 = vrot.lane.b32.xlu1 %v756_v15, %s806_s21  ;;  %v776_v33 = vpack.i.bf16 %v483_v29, %v482_v55 }
  0x90   :  { %782 = vrot.lane.b32.xlu0 %v781_v21, %s808_s23  ;;  %v791_v34 = vpack.i.bf16 %v508_v30, %v507_v45 }
  0x91   :  { %v983_v52 = vpop.permute.xlu0 %672 }
  0x92   :  { %v527_v19 = vld.sshfl [vmem:[#allocation1 + $0x8] sm:$0xff pattern:$0x75316420]  ;;  %v526_v40 = vld.sshfl [vmem:[#allocation1] sm:$0xff pattern:$0x75316420]  ;;  %v675_v49 = vunpack.i.h.bf16 %v983_v52  ;;  %v674_v42 = vunpack.i.l.bf16 %v983_v52 }
  0x94   :  { %v529_v39 = vld.sshfl [vmem:[#allocation1 + $0x18] sm:$0xff pattern:$0x75316420]  ;;  %v80_v59 = vsel %vm79_vm1, %v674_v42, %v675_v49  ;;  %v528_v63 = vld.sshfl [vmem:[#allocation1 + $0x10] sm:$0xff pattern:$0x75316420] }
  0x95   :  { %v237_v22 = vsel %vm236_vm14, %v233_v38, %v80_v59 }
  0x97   :  { %762 = vrot.lane.b32.xlu1 %v761_v54, %s806_s21  ;;  %772 = vrot.lane.b32.xlu2 %v771_v27, %s807_s22 }
  0x98   :  { %787 = vrot.lane.b32.xlu0 %v786_v18, %s808_s23 }
  0x99   :  { %v986_v35 = vpop.permute.xlu1 %677 }
  0x9a   :  { %v680_v26 = vunpack.i.h.bf16 %v986_v35  ;;  %v679_v46 = vunpack.i.l.bf16 %v986_v35 }
  0x9c   :  { %v106_v58 = vsel %vm105_vm0, %v679_v46, %v680_v26 }
  0x9d   :  { %v241_v3 = vsel %vm240_vm3, %v80_v59, %v106_v58 }
  0x9f   :  { %532 = vrot.lane.b32.xlu1 %v527_v19, %s809_s28  ;;  %777 = vrot.lane.b32.xlu2 %v776_v33, %s807_s22  ;;  %v997_v41 = vpop.permute.xlu0 %682 }
  0xa0   :  { %792 = vrot.lane.b32.xlu0 %v791_v34, %s808_s23  ;;  %v685_v56 = vunpack.i.h.bf16 %v997_v41  ;;  %v684_v57 = vunpack.i.l.bf16 %v997_v41 }
  0xa1   :  { %v990_v25 = vpop.permute.xlu2 %697 }
  0xa2   :  { %v700_v1 = vunpack.i.h.bf16 %v990_v25  ;;  %v699_v32 = vunpack.i.l.bf16 %v990_v25  ;;  %v129_v2 = vsel %vm128_vm2, %v684_v57, %v685_v56 }
  0xa3   :  { %v245_v16 = vsel %vm244_vm9, %v241_v3, %v129_v2 }
  0xa4   :  { %v207_v15 = vsel %vm206_vm8, %v699_v32, %v700_v1 }
  0xa7   :  { %797 = vrot.lane.b32.xlu1 %v796_v36, %s805_s20  ;;  %536 = vrot.lane.b32.xlu2 %v529_v39, %s809_s28 }
  0xa8   :  { %530 = vrot.lane.b32.xlu0 %v526_v40, %s809_s28 }
  0xa9   :  { %v1001_v47 = vpop.permute.xlu1 %687  ;;  %v221_v48 = vpop.permute.xlu2 %220 }
  0xaa   :  { %v690_v9 = vunpack.i.h.bf16 %v1001_v47  ;;  %v689_v0 = vunpack.i.l.bf16 %v1001_v47 }
  0xac   :  { %v155_v14 = vsel %vm154_vm7, %v689_v0, %v690_v9 }
  0xad   :  { %v249_v51 = vsel %vm248_vm13, %v245_v16, %v155_v14 }
  0xaf   :  { %368 = vrot.lane.b32.xlu1 %v361_v43, %s802_s2 }
  0xb0   :  { %534 = vrot.lane.b32.xlu0 %v528_v63, %s809_s28 }
  0xb1   :  { %v1026_v7 = vpop.permute.xlu1 %692  ;;  %v223_v37 = vpop.permute.xlu2 %222 }
  0xb2   :  { %v695_v13 = vunpack.i.h.bf16 %v1026_v7  ;;  %v694_v31 = vunpack.i.l.bf16 %v1026_v7  ;;  %v229_v11 = vsel %vm228_vm4, %v221_v48, %v223_v37 }
  0xb3   :  { %640 = vmatpush.msk.msra.mxu0 %vm232_vm6, %v229_v11 }
  0xb4   :  { %v181_v17 = vsel %vm180_vm10, %v694_v31, %v695_v13 }
  0xb5   :  { %v253_v21 = vsel %vm252_vm11, %v155_v14, %v181_v17 }
  0xb6   :  { %v257_v44 = vsel %vm256_vm12, %v253_v21, %v207_v15 }
  0xb7   :  { %283 = vmatpush.msra.mxu0 %v257_v44 }
  0xb8   :  { %366 = vrot.lane.b32.xlu0 %v360_v20, %s802_s2 }
  0xb9   :  { %284 = vmatpush.msra.mxu0 %v249_v51  ;;  %v1058_v4 = vpop.permute.xlu2 %702 }
  0xba   :  { %v704_v57 = vunpack.i.l.bf16 %v1058_v4 }
  0xbb   :  { %285 = vmatpush.msra.mxu0 %v237_v22 }
  0xbc   :  { %641 = vmatmul.msk.f32.vlgmr.msra.gmra.mxu0 %vm260_vm15, %v1054_v8 }
  0xbf   :  { %v225_v23 = vpop.permute.xlu0 %224 }
  0xc0   :  { %v230_v24 = vsel %vm228_vm4, %v223_v37, %v225_v23  ;;  %v55_v37 = vsel %vm53_vm5, %v670_v50, %v704_v57 }
  0xc1   :  { %642 = vmatpush.msk.msra.mxu1 %vm232_vm6, %v230_v24  ;;  %v234_v28 = vsel %vm232_vm6, %v847_v5, %v55_v37 }
  0xc7   :  { %v227_v18 = vpop.permute.xlu0 %226 }
  0xc8   :  { %v231_v55 = vsel %vm228_vm4, %v225_v23, %v227_v18 }
  0xc9   :  { %v1062_v54 = vpop.permute.xlu2 %727  ;;  %644 = vmatpush.msk.msra.mxu2 %vm232_vm6, %v231_v55 }
  0xca   :  { %v729_v27 = vunpack.i.l.bf16 %v1062_v54 }
  0xcc   :  { %v107_v29 = vsel %vm105_vm0, %v680_v26, %v729_v27 }
  0xd1   :  { %v1072_v30 = vpop.permute.xlu2 %732  ;;  %v1086_v35 = vpop.permute.xlu0 %707 }
  0xd2   :  { %v735_v41 = vunpack.i.h.bf16 %v1072_v30 }
  0xd4   :  { %v108_v16 = vsel %vm105_vm0, %v729_v27, %v735_v41 }
  0xd9   :  { %v1070_v45 = vpop.permute.xlu1 %712  ;;  %v1076_v19 = vpop.permute.xlu2 %737 }
  0xda   :  { %v714_v48 = vunpack.i.l.bf16 %v1070_v45 }
  0xdc   :  { %v81_v63 = vsel %vm79_vm1, %v675_v49, %v714_v48 }
  0xdd   :  { %v242_v7 = vsel %vm240_vm3, %v81_v63, %v107_v29  ;;  %v238_v14 = vsel %vm236_vm14, %v234_v28, %v81_v63  ;;  %v705_v29 = vunpack.i.h.bf16 %v1058_v4 }
  0xe1   :  { %v1074_v33 = vpop.permute.xlu1 %717  ;;  %v1080_v36 = vpop.permute.xlu2 %742 }
  0xe2   :  { %v744_v42 = vunpack.i.l.bf16 %v1080_v36 }
  0xe4   :  { %v130_v3 = vsel %vm128_vm2, %v685_v56, %v744_v42  ;;  %v720_v56 = vunpack.i.h.bf16 %v1074_v33 }
  0xe5   :  { %v246_v25 = vsel %vm244_vm9, %v242_v7, %v130_v3 }
  0xe6   :  { %v82_v17 = vsel %vm79_vm1, %v714_v48, %v720_v56 }
  0xe7   :  { %v243_v23 = vsel %vm240_vm3, %v82_v17, %v108_v16 }
  0xe9   :  { %v1078_v34 = vpop.permute.xlu1 %722  ;;  %v1088_v26 = vpop.permute.xlu2 %767 }
  0xea   :  { %v769_v43 = vunpack.i.l.bf16 %v1088_v26  ;;  %v770_v4 = vunpack.i.h.bf16 %v1088_v26 }
  0xec   :  { %v182_v2 = vsel %vm180_vm10, %v695_v13, %v769_v43 }
  0xf1   :  { %v1082_v39 = vpop.permute.xlu1 %747  ;;  %v1106_v32 = vpop.permute.xlu2 %772 }
  0xf2   :  { %v775_v52 = vunpack.i.h.bf16 %v1106_v32  ;;  %v750_v10 = vunpack.i.h.bf16 %v1082_v39  ;;  %v774_v63 = vunpack.i.l.bf16 %v1106_v32 }
  0xf4   :  { %v183_v15 = vsel %vm180_vm10, %v769_v43, %v775_v52  ;;  %v131_v5 = vsel %vm128_vm2, %v744_v42, %v750_v10  ;;  %v730_v43 = vunpack.i.h.bf16 %v1062_v54  ;;  %v739_v52 = vunpack.i.l.bf16 %v1076_v19 }
  0xf5   :  { %v247_v24 = vsel %vm244_vm9, %v243_v23, %v131_v5 }
  0xf9   :  { %v1084_v40 = vpop.permute.xlu1 %752 }
  0xfa   :  { %v754_v46 = vunpack.i.l.bf16 %v1084_v40  ;;  %v755_v3 = vunpack.i.h.bf16 %v1084_v40 }
  0xfc   :  { %v156_v59 = vsel %vm154_vm7, %v690_v9, %v754_v46 }
  0xfd   :  { %v254_v9 = vsel %vm252_vm11, %v156_v59, %v182_v2  ;;  %v250_v31 = vsel %vm248_vm13, %v246_v25, %v156_v59  ;;  %v715_v59 = vunpack.i.h.bf16 %v1070_v45  ;;  %v749_v2 = vunpack.i.l.bf16 %v1082_v39 }
  0xfe   :  { %v492_v39 = vsel %vm180_vm10, %v770_v4, %v774_v63 }
 0x101   :  { %v1094_v53 = vpop.permute.xlu1 %757 }
 0x102   :  { %v1097_v58 = vpop.permute.xlu0 %782  ;;  %v760_v13 = vunpack.i.h.bf16 %v1094_v53  ;;  %v759_v26 = vunpack.i.l.bf16 %v1094_v53 }
 0x103   :  { %v784_v0 = vunpack.i.l.bf16 %v1097_v58  ;;  %v785_v32 = vunpack.i.h.bf16 %v1097_v58 }
 0x104   :  { %v157_v21 = vsel %vm154_vm7, %v754_v46, %v760_v13  ;;  %v709_v46 = vunpack.i.l.bf16 %v1086_v35  ;;  %v467_v25 = vsel %vm154_vm7, %v755_v3, %v759_v26 }
 0x105   :  { %v208_v47 = vsel %vm206_vm8, %v700_v1, %v784_v0  ;;  %v710_v1 = vunpack.i.h.bf16 %v1086_v35  ;;  %v255_v51 = vsel %vm252_vm11, %v157_v21, %v183_v15  ;;  %v251_v18 = vsel %vm248_vm13, %v247_v24, %v157_v21 }
 0x106   :  { %v258_v49 = vsel %vm256_vm12, %v254_v9, %v208_v47  ;;  %v370_v45 = vsel %vm53_vm5, %v705_v29, %v709_v46  ;;  %v778_v47 = vpop.permute.xlu2 %777  ;;  %v556_v10 = vsel %vm252_vm11, %v467_v25, %v492_v39 }
 0x107   :  { %303 = vmatpush.msra.mxu1 %v258_v49  ;;  %v56_v38 = vsel %vm53_vm5, %v704_v57, %v710_v1  ;;  %v734_v57 = vunpack.i.l.bf16 %v1072_v30  ;;  %v541_v9 = vsel %vm232_vm6, %v916_v60, %v370_v45  ;;  %v780_v41 = vunpack.i.h.bf16 %v778_v47 }
 0x108   :  { %v235_v27 = vsel %vm232_vm6, %v850_v6, %v56_v38  ;;  %v719_v6 = vunpack.i.l.bf16 %v1074_v33  ;;  %v725_v60 = vunpack.i.h.bf16 %v1078_v34  ;;  %v779_v1 = vunpack.i.l.bf16 %v778_v47 }
 0x109   :  { %304 = vmatpush.msra.mxu1 %v250_v31  ;;  %v1129_v11 = vpop.permute.xlu1 %762  ;;  %v239_v42 = vsel %vm236_vm14, %v235_v27, %v82_v17  ;;  %v420_v30 = vsel %vm105_vm0, %v730_v43, %v734_v57 }
 0x10a   :  { %v1133_v50 = vpop.permute.xlu0 %787  ;;  %v395_v33 = vsel %vm79_vm1, %v715_v59, %v719_v6  ;;  %v765_v58 = vunpack.i.h.bf16 %v1129_v11  ;;  %v764_v13 = vunpack.i.l.bf16 %v1129_v11  ;;  %v494_v21 = vsel %vm180_vm10, %v779_v1, %v780_v41 }
 0x10b   :  { %v790_v20 = vunpack.i.h.bf16 %v1133_v50  ;;  %305 = vmatpush.msra.mxu1 %v238_v14  ;;  %v789_v54 = vunpack.i.l.bf16 %v1133_v50  ;;  %v547_v53 = vsel %vm240_vm3, %v395_v33, %v420_v30  ;;  %v493_v23 = vsel %vm180_vm10, %v774_v63, %v779_v1 }
 0x10c   :  { %643 = vmatmul.msk.f32.vlgmr.msra.gmra.mxu1 %vm260_vm15, %v1054_v8 }
 0x10d   :  { %v209_v44 = vsel %vm206_vm8, %v784_v0, %v790_v20  ;;  %v745_v0 = vunpack.i.h.bf16 %v1080_v36  ;;  %v740_v36 = vunpack.i.h.bf16 %v1076_v19  ;;  %v517_v37 = vsel %vm206_vm8, %v785_v32, %v789_v54 }
 0x10e   :  { %v259_v22 = vsel %vm256_vm12, %v255_v51, %v209_v44  ;;  %v724_v19 = vunpack.i.l.bf16 %v1078_v34  ;;  %v559_v50 = vsel %vm256_vm12, %v556_v10, %v517_v37  ;;  %v421_v34 = vsel %vm105_vm0, %v734_v57, %v739_v52  ;;  %v537_v44 = vpop.permute.xlu2 %536 }
 0x10f   :  { %323 = vmatpush.msra.mxu2 %v259_v22  ;;  %v442_v40 = vsel %vm128_vm2, %v745_v0, %v749_v2  ;;  %v469_v20 = vsel %vm154_vm7, %v764_v13, %v765_v58  ;;  %v422_v11 = vsel %vm105_vm0, %v739_v52, %v740_v36  ;;  %v544_v51 = vsel %vm236_vm14, %v541_v9, %v395_v33 }
 0x110   :  { %v550_v16 = vsel %vm244_vm9, %v547_v53, %v442_v40  ;;  %v396_v5 = vsel %vm79_vm1, %v719_v6, %v724_v19  ;;  %v397_v38 = vsel %vm79_vm1, %v724_v19, %v725_v60  ;;  %v468_v22 = vsel %vm154_vm7, %v759_v26, %v764_v13 }
 0x111   :  { %324 = vmatpush.msra.mxu2 %v251_v18  ;;  %v1153_v55 = vpop.permute.xlu1 %532  ;;  %v553_v17 = vsel %vm248_vm13, %v550_v16, %v467_v25  ;;  %v548_v59 = vsel %vm240_vm3, %v396_v5, %v421_v34  ;;  %v549_v6 = vsel %vm240_vm3, %v397_v38, %v422_v11  ;;  %v557_v4 = vsel %vm252_vm11, %v468_v22, %v493_v23 }
 0x112   :  { %v1157_v48 = vpop.permute.xlu0 %792 }
 0x113   :  { %325 = vmatpush.msra.mxu2 %v239_v42  ;;  %v795_v14 = vunpack.i.h.bf16 %v1157_v48  ;;  %v794_v15 = vunpack.i.l.bf16 %v1157_v48  ;;  %v558_v42 = vsel %vm252_vm11, %v469_v20, %v494_v21 }
 0x114   :  { %645 = vmatmul.msk.f32.vlgmr.msra.gmra.mxu2 %vm260_vm15, %v1054_v8 }
 0x115   :  { %v518_v29 = vsel %vm206_vm8, %v789_v54, %v794_v15  ;;  %v519_v48 = vsel %vm206_vm8, %v794_v15, %v795_v14 }
 0x119   :  { %v798_v49 = vpop.permute.xlu1 %797 }
 0x11a   :  { %v531_v7 = vpop.permute.xlu0 %530  ;;  %v800_v31 = vunpack.i.h.bf16 %v798_v49  ;;  %v799_v28 = vunpack.i.l.bf16 %v798_v49 }
 0x11b   :  { %v538_v56 = vsel %vm228_vm4, %v531_v7, %v1153_v55 }
 0x11c   :  { %648 = vmatpush.msk.msra.mxu3 %vm232_vm6, %v538_v56  ;;  %v443_v24 = vsel %vm128_vm2, %v749_v2, %v799_v28  ;;  %v444_v27 = vsel %vm128_vm2, %v799_v28, %v800_v31  ;;  %v560_v2 = vsel %vm256_vm12, %v557_v4, %v518_v29 }
 0x11d   :  { %v551_v63 = vsel %vm244_vm9, %v548_v59, %v443_v24  ;;  %v552_v0 = vsel %vm244_vm9, %v549_v6, %v444_v27 }
 0x11e   :  { %581 = vmatpush.msra.mxu3 %v559_v50  ;;  %v554_v54 = vsel %vm248_vm13, %v551_v63, %v468_v22  ;;  %v555_v45 = vsel %vm248_vm13, %v552_v0, %v469_v20 }
 0x120   :  { %582 = vmatpush.msra.mxu3 %v553_v17 }
 0x121   :  { %v369_v30 = vpop.permute.xlu1 %368 }
 0x122   :  { %v535_v18 = vpop.permute.xlu0 %534  ;;  %583 = vmatpush.msra.mxu3 %v544_v51 }
 0x123   :  { %649 = vmatmul.msk.f32.vlgmr.msra.gmra.mxu3 %vm260_vm15, %v1054_v8  ;;  %v539_v43 = vsel %vm228_vm4, %v1153_v55, %v535_v18  ;;  %v540_v57 = vsel %vm228_vm4, %v535_v18, %v537_v44  ;;  %v561_v55 = vsel %vm256_vm12, %v558_v42, %v519_v48 }
 0x124   :  { %650 = vmatpush.msk.msrb.mxu0 %vm232_vm6, %v539_v43  ;;  %652 = vmatpush.msk.msrb.mxu1 %vm232_vm6, %v540_v57 }
 0x126   :  { %601 = vmatpush.msrb.mxu0 %v560_v2  ;;  %621 = vmatpush.msrb.mxu1 %v561_v55 }
 0x128   :  { %602 = vmatpush.msrb.mxu0 %v554_v54  ;;  %622 = vmatpush.msrb.mxu1 %v555_v45 }
 0x12a   :  { %v367_v33 = vpop.permute.xlu0 %366 }
 0x12b   :  { %v371_v3 = vsel %vm53_vm5, %v709_v46, %v367_v33  ;;  %v372_v26 = vsel %vm53_vm5, %v367_v33, %v369_v30 }
 0x12c   :  { %v542_v32 = vsel %vm232_vm6, %v918_v61, %v371_v3  ;;  %v543_v47 = vsel %vm232_vm6, %v921_v62, %v372_v26 }
 0x12d   :  { %v545_v36 = vsel %vm236_vm14, %v542_v32, %v396_v5  ;;  %v546_v39 = vsel %vm236_vm14, %v543_v47, %v397_v38 }
 0x12e   :  { %603 = vmatpush.msrb.mxu0 %v545_v36  ;;  %623 = vmatpush.msrb.mxu1 %v546_v39 }
 0x12f   :  { %651 = vmatmul.msk.f32.vlgmr.msrb.gmra.mxu0 %vm260_vm15, %v1054_v8  ;;  %653 = vmatmul.msk.f32.vlgmr.msrb.gmra.mxu1 %vm260_vm15, %v1054_v8 }
 0x139   :  { %v287_v35 = vpop.f32.mrf.mxu0 }
 0x13a   :  { %v288_v61 = vadd.f32 %v287_v35, %v969_v12 }
 0x189   :  { %v307_v46 = vpop.f32.mrf.mxu1 }
 0x18a   :  { %v308_v9 = vadd.f32 %v307_v46, %v969_v12 }
 0x18c   :  { %v332_v52 = vrot.slane %v308_v9, 4 }
 0x18e   :  { %v333_v62 = vsel %vm244_vm9, %v288_v61, %v332_v52 }
 0x18f   :  { %335 = vst [vmem:[%s1268_s3] sm:$0x77] %v333_v62 }
 0x197   :  { %v327_v49 = vpop.f32.mrf.mxu2 }
 0x198   :  { %v328_v7 = vadd.f32 %v327_v49, %v969_v12 }
 0x19a   :  { %336 = vst [vmem:[%s1268_s3 + $0x8] sm:$0x7] %v328_v7 }
 0x1a6   :  { %v585_v8 = vpop.f32.mrf.mxu3 }
 0x1a7   :  { %v586_v41 = vadd.f32 %v585_v8, %v969_v12 }
 0x1ac   :  { %v605_v37 = vpop.f32.mrf.mxu0  ;;  %v625_v40 = vpop.f32.mrf.mxu1 }
 0x1ad   :  { %v606_v53 = vadd.f32 %v605_v37, %v969_v12  ;;  %v626_v58 = vadd.f32 %v625_v40, %v969_v12 }
 0x1af   :  { %v630_v56 = vrot.slane %v606_v53, 4  ;;  %655 = vst [vmem:[%s1268_s3 + $0x14] sm:$0x7] %v626_v58 }
 0x1b1   :  { %v631_v25 = vsel %vm244_vm9, %v586_v41, %v630_v56 }
 0x1b2   :  { %654 = vst [vmem:[%s1268_s3 + $0xc] sm:$0x77] %v631_v25 }

</bundles_post_ra>
